<compile_context>
chip_gen: v6e
topology: v6e:2x2x1
jax: 0.10.0
libtpu: 0.0.40
codegen_flags: <defaults>
</compile_context>

<pallas_src>
import jax
import jax.numpy as jnp
from jax.experimental import pallas as pl
from jax.experimental.pallas import tpu as pltpu


def _round_up(x, m):
    return ((x + m - 1) // m) * m


# ----------------------------- Pallas kernel -----------------------------

def _ffn_lm_kernel(x_ref, w1_ref, b1_ref, w2_ref, b2_ref, o_ref, h_ref):
    """Fused  relu(x @ W1 + b1) @ W2 + b2  for one (row-tile, vocab-tile)."""
    # Hidden activations depend only on the row tile -> compute them once per
    # row tile (first vocab tile) and keep them resident in VMEM scratch.
    @pl.when(pl.program_id(1) == 0)
    def _():
        h = jnp.dot(x_ref[...], w1_ref[...], preferred_element_type=jnp.float32)
        h_ref[...] = jnp.maximum(h + b1_ref[...], 0.0)

    o_ref[...] = (
        jnp.dot(h_ref[...], w2_ref[...], preferred_element_type=jnp.float32)
        + b2_ref[...]
    ).astype(o_ref.dtype)


# ----------------------------- wrapper -----------------------------

def ffn_lm_forward(params, inputs, *, tn_max=512, tm_max=256):
    """inputs: (B, context_size) int32 token ids. Returns (B, vocab) logits."""
    B, C = inputs.shape
    emb = params["emb"]                       # (V, E)
    V, E = emb.shape
    CE = C * E
    H = params["w1_t"].shape[1]

    # Embedding gather + reshape stays in plain JAX (data-dependent gather).
    x = jnp.take(emb, inputs, axis=0).reshape(B, CE).astype(jnp.float32)

    w1_t = params["w1_t"]                     # (CE, H)
    b1 = params["b1"]                         # (H,)
    w2_t = params["w2_t"]                     # (H, V)
    b2 = params["b2"]                         # (V,)

    # --- pad contraction dims to lane-dense multiples of 128 (zeros are
    #     mathematically inert in both matmuls + ReLU) ---
    CEp = _round_up(CE, 128)
    Hp = _round_up(H, 128)
    if CEp != CE:
        x = jnp.pad(x, ((0, 0), (0, CEp - CE)))
        w1_t = jnp.pad(w1_t, ((0, CEp - CE), (0, 0)))
    if Hp != H:
        w1_t = jnp.pad(w1_t, ((0, 0), (0, Hp - H)))
        b1 = jnp.pad(b1, (0, Hp - H))
        w2_t = jnp.pad(w2_t, ((0, Hp - H), (0, 0)))

    # --- row (batch) tiling: multiples of 8 sublanes, up to tm_max rows ---
    tm = min(tm_max, _round_up(B, 8))
    Bp = _round_up(B, tm)
    if Bp != B:
        x = jnp.pad(x, ((0, Bp - B), (0, 0)))

    # --- vocab tiling: lane-dense multiples of 128 -> unmasked stores ---
    tn = min(tn_max, _round_up(V, 128))
    Vp = _round_up(V, tn)
    if Vp != V:
        w2_t = jnp.pad(w2_t, ((0, 0), (0, Vp - V)))
        b2 = jnp.pad(b2, (0, Vp - V))

    grid = (Bp // tm, Vp // tn)

    out = pl.pallas_call(
        _ffn_lm_kernel,
        out_shape=jax.ShapeDtypeStruct((Bp, Vp), jnp.float32),
        grid_spec=pltpu.PrefetchScalarGridSpec(
            num_scalar_prefetch=0,
            grid=grid,
            in_specs=[
                pl.BlockSpec((tm, CEp), lambda i, j: (i, 0)),   # x (resident over j)
                pl.BlockSpec((CEp, Hp), lambda i, j: (0, 0)),   # W1^T (resident)
                pl.BlockSpec((1, Hp), lambda i, j: (0, 0)),     # b1   (resident)
                pl.BlockSpec((Hp, tn), lambda i, j: (0, j)),    # W2^T vocab tile
                pl.BlockSpec((1, tn), lambda i, j: (0, j)),     # b2   vocab tile
            ],
            out_specs=pl.BlockSpec((tm, tn), lambda i, j: (i, j)),
            scratch_shapes=[pltpu.VMEM((tm, Hp), jnp.float32)],  # hidden acts
        ),
        compiler_params=pltpu.CompilerParams(
            # rows independent (megacore-shardable); vocab axis sequential
            # because the hidden scratch is written at j==0 and reused.
            dimension_semantics=("parallel", "arbitrary"),
        ),
    )(x, w1_t, b1.reshape(1, Hp), w2_t, b2.reshape(1, Vp))

    return out[:B, :V]


# ----------------------------- parameter init -----------------------------

def init_params(key, vocab_size, embedding_dim, hidden_size, context_size):
    k_emb, k_w1, k_b1, k_w2, k_b2 = jax.random.split(key, 5)

    def nrm(k, shape, scale=0.1):
        return scale * jax.random.normal(k, shape, jnp.float32)

    ce = context_size * embedding_dim
    return {
        "emb": nrm(k_emb, (vocab_size, embedding_dim)),
        # Linear weights stored pre-transposed (in_features, out_features)
        # so the kernel does x @ W^T without any in-kernel transpose.
        "w1_t": nrm(k_w1, (ce, hidden_size)),
        "b1": nrm(k_b1, (hidden_size,)),
        "w2_t": nrm(k_w2, (hidden_size, vocab_size)),
        "b2": nrm(k_b2, (vocab_size,)),
    }


# ----------------------------- pure-JAX reference -----------------------------

def ref_forward(params, inputs):
    B, C = inputs.shape
    x = jnp.take(params["emb"], inputs, axis=0).reshape(B, -1)
    h = jnp.maximum(x @ params["w1_t"] + params["b1"], 0.0)
    return h @ params["w2_t"] + params["b2"]


# ----------------------------- main -----------------------------

if __name__ == "__main__":
    VOCAB, EMB, HID, CTX = 100, 8, 32, 4
    BATCH = 8

    key = jax.random.PRNGKey(0)
    kp, ki = jax.random.split(key, 2)
    params = init_params(kp, VOCAB, EMB, HID, CTX)

    inputs = jax.random.randint(ki, (BATCH, CTX), 0, VOCAB, dtype=jnp.int32)

    out = ffn_lm_forward(params, inputs)
    jax.block_until_ready(out)

    out_ref = ref_forward(params, inputs)
    assert out.shape == (BATCH, VOCAB), out.shape
    assert jnp.allclose(out, out_ref, rtol=1e-4, atol=1e-4), (
        float(jnp.max(jnp.abs(out - out_ref))))

    print("KERNEL_OK")
</pallas_src>

<mosaic_0001>
module attributes {stable_mosaic.version = 11 : i64} {
  func.func @_ffn_lm_kernel(%arg0: i32, %arg1: i32, %arg2: memref<8x128xf32, #tpu.memory_space<vmem>>, %arg3: memref<128x128xf32, #tpu.memory_space<vmem>>, %arg4: memref<1x128xf32, #tpu.memory_space<vmem>>, %arg5: memref<128x128xf32, #tpu.memory_space<vmem>>, %arg6: memref<1x128xf32, #tpu.memory_space<vmem>>, %arg7: memref<8x128xf32, #tpu.memory_space<vmem>>, %arg8: memref<8x128xf32, #tpu.memory_space<vmem>>) attributes {dimension_semantics = [#tpu.dimension_semantics<parallel>, #tpu.dimension_semantics<arbitrary>], iteration_bounds = array<i64: 1, 1>, scalar_prefetch = 0 : i64, scratch_operands = 1 : i64, tpu.core_type = #tpu.core_type<tc>, window_params = [{transform_indices = @transform_0, window_bounds = array<i64: 8, 128>}, {pipeline_mode = #tpu.pipeline_mode<synchronous>, transform_indices = @transform_1, window_bounds = array<i64: 128, 128>}, {pipeline_mode = #tpu.pipeline_mode<synchronous>, transform_indices = @transform_2, window_bounds = array<i64: 1, 128>}, {transform_indices = @transform_3, window_bounds = array<i64: 128, 128>}, {transform_indices = @transform_4, window_bounds = array<i64: 1, 128>}, {transform_indices = @transform_5, window_bounds = array<i64: 8, 128>}]} {
    %c0_i32 = arith.constant 0 : i32
    %0 = arith.cmpi eq, %arg1, %c0_i32 : i32
    %1 = arith.extui %0 : i1 to i32
    %c0_i32_0 = arith.constant 0 : i32
    %2 = arith.cmpi ne, %1, %c0_i32_0 : i32
    scf.if %2 {
      %c0_8 = arith.constant 0 : index
      %c0_9 = arith.constant 0 : index
      %10 = vector.load %arg2[%c0_8, %c0_9] : memref<8x128xf32, #tpu.memory_space<vmem>>, vector<8x128xf32>
      %c0_10 = arith.constant 0 : index
      %c0_11 = arith.constant 0 : index
      %11 = vector.load %arg3[%c0_10, %c0_11] : memref<128x128xf32, #tpu.memory_space<vmem>>, vector<128x128xf32>
      %cst_12 = arith.constant dense<0.000000e+00> : vector<8x128xf32>
      %12 = tpu.matmul %10, %11, %cst_12 {dimension_numbers = #tpu.dot_dimension_numbers<[1], [0], [0], [1], [0, 0, 1, 1], [], []>} : vector<8x128xf32>, vector<128x128xf32>, vector<8x128xf32> -> vector<8x128xf32>
      %c0_13 = arith.constant 0 : index
      %c0_14 = arith.constant 0 : index
      %13 = vector.load %arg4[%c0_13, %c0_14] : memref<1x128xf32, #tpu.memory_space<vmem>>, vector<1x128xf32>
      %14 = vector.broadcast %13 : vector<1x128xf32> to vector<8x128xf32>
      %15 = arith.addf %12, %14 : vector<8x128xf32>
      %cst_15 = arith.constant 0.000000e+00 : f32
      %16 = vector.broadcast %cst_15 : f32 to vector<8x128xf32>
      %17 = arith.maximumf %15, %16 : vector<8x128xf32>
      %c0_16 = arith.constant 0 : index
      %c0_17 = arith.constant 0 : index
      %18 = vector.load %arg8[%c0_16, %c0_17] : memref<8x128xf32, #tpu.memory_space<vmem>>, vector<8x128xf32>
      tpu.vector_store %arg8[%c0_16, %c0_17], %17 {strides = array<i32>} : memref<8x128xf32, #tpu.memory_space<vmem>>, vector<8x128xf32>,
    } else {
    }
    %c0 = arith.constant 0 : index
    %c0_1 = arith.constant 0 : index
    %3 = vector.load %arg8[%c0, %c0_1] : memref<8x128xf32, #tpu.memory_space<vmem>>, vector<8x128xf32>
    %c0_2 = arith.constant 0 : index
    %c0_3 = arith.constant 0 : index
    %4 = vector.load %arg5[%c0_2, %c0_3] : memref<128x128xf32, #tpu.memory_space<vmem>>, vector<128x128xf32>
    %cst = arith.constant dense<0.000000e+00> : vector<8x128xf32>
    %5 = tpu.matmul %3, %4, %cst {dimension_numbers = #tpu.dot_dimension_numbers<[1], [0], [0], [1], [0, 0, 1, 1], [], []>} : vector<8x128xf32>, vector<128x128xf32>, vector<8x128xf32> -> vector<8x128xf32>
    %c0_4 = arith.constant 0 : index
    %c0_5 = arith.constant 0 : index
    %6 = vector.load %arg6[%c0_4, %c0_5] : memref<1x128xf32, #tpu.memory_space<vmem>>, vector<1x128xf32>
    %7 = vector.broadcast %6 : vector<1x128xf32> to vector<8x128xf32>
    %8 = arith.addf %5, %7 : vector<8x128xf32>
    %c0_6 = arith.constant 0 : index
    %c0_7 = arith.constant 0 : index
    %9 = vector.load %arg7[%c0_6, %c0_7] : memref<8x128xf32, #tpu.memory_space<vmem>>, vector<8x128xf32>
    tpu.vector_store %arg7[%c0_6, %c0_7], %8 {strides = array<i32>} : memref<8x128xf32, #tpu.memory_space<vmem>>, vector<8x128xf32>,
    return
  }
  func.func @transform_0(%arg0: i32, %arg1: i32) -> (i32, i32) {
    %c0_i32 = arith.constant 0 : i32
    %c0_i32_0 = arith.constant 0 : i32
    return %arg0, %c0_i32 : i32, i32
  }
  func.func @transform_1(%arg0: i32, %arg1: i32) -> (i32, i32) {
    %c0_i32 = arith.constant 0 : i32
    %c0_i32_0 = arith.constant 0 : i32
    %c0_i32_1 = arith.constant 0 : i32
    return %c0_i32, %c0_i32_0 : i32, i32
  }
  func.func @transform_2(%arg0: i32, %arg1: i32) -> (i32, i32) {
    %c0_i32 = arith.constant 0 : i32
    %c0_i32_0 = arith.constant 0 : i32
    %c0_i32_1 = arith.constant 0 : i32
    return %c0_i32, %c0_i32_0 : i32, i32
  }
  func.func @transform_3(%arg0: i32, %arg1: i32) -> (i32, i32) {
    %c0_i32 = arith.constant 0 : i32
    %c0_i32_0 = arith.constant 0 : i32
    return %c0_i32, %arg1 : i32, i32
  }
  func.func @transform_4(%arg0: i32, %arg1: i32) -> (i32, i32) {
    %c0_i32 = arith.constant 0 : i32
    %c0_i32_0 = arith.constant 0 : i32
    return %c0_i32, %arg1 : i32, i32
  }
  func.func @transform_5(%arg0: i32, %arg1: i32) -> (i32, i32) {
    %c0_i32 = arith.constant 0 : i32
    return %arg0, %arg1 : i32, i32
  }
}

</mosaic_0001>

<bundles_post_ra>
// kernel: tpu_custom_call.1
= control target key start
LH: loop header
LB: loop body
LE: loop exit
PB: predicated region body
PF: predicated region fallthrough
CT: control target
= control target key end

     0   :  { %10 = vsyncpa [#allocation4], 0  ;;  %s561_s0 = inlined_call_operand.hbm [shape: f32[8,128], index: 0, kind: input, shape index: {}]   ;;  %s562_s1 = inlined_call_operand.hbm [shape: f32[128,128], index: 1, kind: input, shape index: {}]   ;;  %s563_s2 = inlined_call_operand.vmem [shape: f32[1,128], index: 2, kind: input, shape index: {}]   ;;  %s564_s3 = inlined_call_operand.hbm [shape: f32[128,128], index: 3, kind: input, shape index: {}]   ;;  %s565_s4 = inlined_call_operand.vmem [shape: f32[1,128], index: 4, kind: input, shape index: {}]   ;;  %s566_s5 = inlined_call_operand.hbm [shape: f32[8,128], index: 5, kind: output, shape index: {}]  }
   0x1   :  { %11 = vsyncpa [#allocation7], 0 }
   0x2   :  { %12 = vsyncpa [#allocation5], 0  ;;  %s471_s18 = smov [#allocation6]  }
   0x3   :  { %s28_s19 = sshll.u32 %s471_s18, 4  ;;  %s29_s19 = int_to_ptr.vmem [resolvable:$true] %s28_s19 }
   0x4   :  { %s393_s20 = scalar_lea.vmem %s29_s19, 2048  ;;  %p398_p1 = scmp.lt.s32.totalorder %s29_s19, %s29_s19 }
   0x5   :  { %p394_p0 = scmp.ne.s32.totalorder %s29_s19, %s393_s20  ;;  %p399_p2 = scmp.lt.s32.totalorder %s393_s20, %s393_s20 }
   0x7   :  { %p400_p3 = por %p399_p2, %p398_p1 }
   0x9   :  { %p401_p4 = pnand %p400_p3, %p394_p0 }
   0xb   :  { %404 = shalt.err (!%p401_p4)
}
   0xc   :  { %s472_s21 = smov 128   ;;  %s473_s22 = smov 8  }
   0xd   :  { %34 = dma.hbm_to_vmem [thread:$0]  %s562_s1, 2048, %s29_s19, [#allocation7], %s472_s21, %s472_s21, %s473_s22  }
   0xe   :  { %s474_s25 = smov [#allocation3]   ;;  %s475_s27 = smov [#allocation8]  }
   0xf   :  { %s19_s26 = sshll.u32 %s474_s25, 4  ;;  %s42_s28 = sshll.u32 %s475_s27, 4  ;;  %s20_s26 = int_to_ptr.vmem [resolvable:$true] %s19_s26  ;;  %s43_s28 = int_to_ptr.vmem [resolvable:$true] %s42_s28 }
  0x10   :  { %s413_s29 = scalar_lea.vmem %s20_s26, 128  ;;  %p418_p6 = scmp.lt.s32.totalorder %s20_s26, %s20_s26 }
  0x11   :  { %p414_p5 = scmp.ne.s32.totalorder %s20_s26, %s413_s29  ;;  %p419_p7 = scmp.lt.s32.totalorder %s413_s29, %s413_s29 }
  0x13   :  { %p420_p8 = por %p419_p7, %p418_p6 }
  0x15   :  { %p421_p9 = pnand %p420_p8, %p414_p5 }
  0x17   :  { %424 = shalt.err (!%p421_p9)
}
  0x18   :  { %22 = dma.hbm_to_vmem [thread:$0]  %s561_s0, 128, %s20_s26, [#allocation4]  }
  0x19   :  { %s433_s7 = scalar_lea.vmem %s43_s28, 2048  ;;  %p438_p11 = scmp.lt.s32.totalorder %s43_s28, %s43_s28 }
  0x1a   :  { %p434_p10 = scmp.ne.s32.totalorder %s43_s28, %s433_s7  ;;  %p439_p12 = scmp.lt.s32.totalorder %s433_s7, %s433_s7 }
  0x1c   :  { %p440_p13 = por %p439_p12, %p438_p11 }
  0x1e   :  { %p441_p0 = pnand %p440_p13, %p434_p10 }
  0x20   :  { %444 = shalt.err (!%p441_p0)
}
  0x21   :  { %48 = dma.hbm_to_vmem [thread:$0]  %s564_s3, 2048, %s43_s28, [#allocation7], %s472_s21, %s472_s21, %s473_s22  }
  0x22   :  { %465 = dma.done.wait [#allocation4], 128  }
  0x23   :  { %466 = vsyncadd [#allocation4], 4294967168 }
  0x24   :  { %467 = dma.done.wait [#allocation7], 4096  }
  0x25   :  { %468 = vsyncadd [#allocation7], 4294963200  ;;  %v476_v0 = vmov 0.0   ;;  %vm477_vm0 = vmmov 0   ;;  %v80_v1 = vld [vmem:[#allocation6 + $0x78] sm:$0xff]  ;;  %v79_v2 = vld [vmem:[#allocation6 + $0x70] sm:$0xff] }
  0x26   :  { %307 = vmatprep.subr.mxu0 %v476_v0  ;;  %339 = vmatprep.mubr.msk.f32.mxu0 %vm477_vm0, %v476_v0  ;;  %v78_v3 = vld [vmem:[#allocation6 + $0x68] sm:$0xff]  ;;  %v77_v4 = vld [vmem:[#allocation6 + $0x60] sm:$0xff]  ;;  %v176_v5 = vld [vmem:[#allocation8 + $0x78] sm:$0xff]  ;;  %s478_s11 = smov [#allocation9]  }
  0x27   :  { %342 = vmatprep.subr.mxu1 %v476_v0  ;;  %374 = vmatprep.mubr.msk.f32.mxu1 %vm477_vm0, %v476_v0  ;;  %v76_v6 = vld [vmem:[#allocation6 + $0x58] sm:$0xff]  ;;  %v175_v7 = vld [vmem:[#allocation8 + $0x70] sm:$0xff]  ;;  %v174_v8 = vld [vmem:[#allocation8 + $0x68] sm:$0xff]  ;;  %s261_s12 = sshll.u32 %s478_s11, 4  ;;  %s262_s12 = int_to_ptr.vmem [resolvable:$true] %s261_s12 }
  0x28   :  { %308 = vmatpush3.msra.mxu0 %v80_v1  ;;  %343 = vmatpush3.msra.mxu1 %v176_v5  ;;  %v75_v9 = vld [vmem:[#allocation6 + $0x50] sm:$0xff]  ;;  %v173_v10 = vld [vmem:[#allocation8 + $0x60] sm:$0xff]  ;;  %v74_v11 = vld [vmem:[#allocation6 + $0x48] sm:$0xff]  ;;  %s445_s13 = scalar_lea.vmem %s262_s12, 128  ;;  %p450_p2 = scmp.lt.s32.totalorder %s262_s12, %s262_s12 }
  0x29   :  { %309 = vmatprep.subr.mxu0 %v476_v0  ;;  %344 = vmatprep.subr.mxu1 %v476_v0  ;;  %v172_v12 = vld [vmem:[#allocation8 + $0x58] sm:$0xff]  ;;  %v73_v13 = vld [vmem:[#allocation6 + $0x40] sm:$0xff]  ;;  %v171_v14 = vld [vmem:[#allocation8 + $0x50] sm:$0xff]  ;;  %p446_p1 = scmp.ne.s32.totalorder %s262_s12, %s445_s13  ;;  %p451_p3 = scmp.lt.s32.totalorder %s445_s13, %s445_s13 }
  0x2a   :  { %310 = vmatpush3.msra.mxu0 %v79_v2  ;;  %345 = vmatpush3.msra.mxu1 %v175_v7  ;;  %v72_v15 = vld [vmem:[#allocation6 + $0x38] sm:$0xff]  ;;  %v170_v16 = vld [vmem:[#allocation8 + $0x48] sm:$0xff]  ;;  %v71_v17 = vld [vmem:[#allocation6 + $0x30] sm:$0xff] }
  0x2b   :  { %311 = vmatprep.subr.mxu0 %v476_v0  ;;  %346 = vmatprep.subr.mxu1 %v476_v0  ;;  %v169_v18 = vld [vmem:[#allocation8 + $0x40] sm:$0xff]  ;;  %v70_v19 = vld [vmem:[#allocation6 + $0x28] sm:$0xff]  ;;  %v168_v20 = vld [vmem:[#allocation8 + $0x38] sm:$0xff]  ;;  %p452_p4 = por %p451_p3, %p450_p2 }
  0x2c   :  { %312 = vmatpush3.msra.mxu0 %v78_v3  ;;  %347 = vmatpush3.msra.mxu1 %v174_v8  ;;  %v69_v21 = vld [vmem:[#allocation6 + $0x20] sm:$0xff]  ;;  %v167_v22 = vld [vmem:[#allocation8 + $0x30] sm:$0xff]  ;;  %v68_v23 = vld [vmem:[#allocation6 + $0x18] sm:$0xff] }
  0x2d   :  { %313 = vmatprep.subr.mxu0 %v476_v0  ;;  %348 = vmatprep.subr.mxu1 %v476_v0  ;;  %v166_v24 = vld [vmem:[#allocation8 + $0x28] sm:$0xff]  ;;  %v67_v25 = vld [vmem:[#allocation6 + $0x10] sm:$0xff]  ;;  %v165_v26 = vld [vmem:[#allocation8 + $0x20] sm:$0xff]  ;;  %p453_p5 = pnand %p452_p4, %p446_p1 }
  0x2e   :  { %314 = vmatpush3.msra.mxu0 %v77_v4  ;;  %349 = vmatpush3.msra.mxu1 %v173_v10  ;;  %v66_v27 = vld [vmem:[#allocation6 + $0x8] sm:$0xff]  ;;  %v164_v28 = vld [vmem:[#allocation8 + $0x18] sm:$0xff]  ;;  %v65_v29 = vld [vmem:[#allocation6] sm:$0xff] }
  0x2f   :  { %315 = vmatprep.subr.mxu0 %v476_v0  ;;  %350 = vmatprep.subr.mxu1 %v476_v0  ;;  %v64_v30 = vld [vmem:[#allocation3] sm:$0xff]  ;;  %v163_v31 = vld [vmem:[#allocation8 + $0x10] sm:$0xff]  ;;  %v162_v32 = vld [vmem:[#allocation8 + $0x8] sm:$0xff] }
  0x30   :  { %316 = vmatpush3.msra.mxu0 %v76_v6  ;;  %351 = vmatpush3.msra.mxu1 %v172_v12  ;;  %v161_v33 = vld [vmem:[#allocation8] sm:$0xff]  ;;  %v271_v34 = vld [vmem:[%s563_s2] ss:$0 sm:$0xff] }
  0x31   :  { %317 = vmatprep.subr.mxu0 %v476_v0  ;;  %352 = vmatprep.subr.mxu1 %v476_v0  ;;  %v272_v39 = vld [vmem:[%s565_s4] ss:$0 sm:$0xff] }
  0x32   :  { %318 = vmatpush3.msra.mxu0 %v75_v9  ;;  %353 = vmatpush3.msra.mxu1 %v171_v14 }
  0x33   :  { %319 = vmatprep.subr.mxu0 %v476_v0  ;;  %354 = vmatprep.subr.mxu1 %v476_v0 }
  0x34   :  { %320 = vmatpush3.msra.mxu0 %v74_v11  ;;  %355 = vmatpush3.msra.mxu1 %v170_v16 }
  0x35   :  { %321 = vmatprep.subr.mxu0 %v476_v0  ;;  %356 = vmatprep.subr.mxu1 %v476_v0 }
  0x36   :  { %322 = vmatpush3.msra.mxu0 %v73_v13  ;;  %357 = vmatpush3.msra.mxu1 %v169_v18 }
  0x37   :  { %323 = vmatprep.subr.mxu0 %v476_v0  ;;  %358 = vmatprep.subr.mxu1 %v476_v0 }
  0x38   :  { %324 = vmatpush3.msra.mxu0 %v72_v15  ;;  %359 = vmatpush3.msra.mxu1 %v168_v20 }
  0x39   :  { %325 = vmatprep.subr.mxu0 %v476_v0  ;;  %360 = vmatprep.subr.mxu1 %v476_v0 }
  0x3a   :  { %326 = vmatpush3.msra.mxu0 %v71_v17  ;;  %361 = vmatpush3.msra.mxu1 %v167_v22 }
  0x3b   :  { %327 = vmatprep.subr.mxu0 %v476_v0  ;;  %362 = vmatprep.subr.mxu1 %v476_v0 }
  0x3c   :  { %328 = vmatpush3.msra.mxu0 %v70_v19  ;;  %363 = vmatpush3.msra.mxu1 %v166_v24 }
  0x3d   :  { %329 = vmatprep.subr.mxu0 %v476_v0  ;;  %364 = vmatprep.subr.mxu1 %v476_v0 }
  0x3e   :  { %330 = vmatpush3.msra.mxu0 %v69_v21  ;;  %365 = vmatpush3.msra.mxu1 %v165_v26 }
  0x3f   :  { %331 = vmatprep.subr.mxu0 %v476_v0  ;;  %366 = vmatprep.subr.mxu1 %v476_v0 }
  0x40   :  { %332 = vmatpush3.msra.mxu0 %v68_v23  ;;  %367 = vmatpush3.msra.mxu1 %v164_v28 }
  0x41   :  { %333 = vmatprep.subr.mxu0 %v476_v0  ;;  %368 = vmatprep.subr.mxu1 %v476_v0 }
  0x42   :  { %334 = vmatpush3.msra.mxu0 %v67_v25  ;;  %369 = vmatpush3.msra.mxu1 %v163_v31 }
  0x43   :  { %335 = vmatprep.subr.mxu0 %v476_v0  ;;  %370 = vmatprep.subr.mxu1 %v476_v0 }
  0x44   :  { %336 = vmatpush3.msra.mxu0 %v66_v27  ;;  %371 = vmatpush3.msra.mxu1 %v162_v32 }
  0x45   :  { %337 = vmatprep.subr.mxu0 %v476_v0  ;;  %372 = vmatprep.subr.mxu1 %v476_v0 }
  0x46   :  { %338 = vmatpush3.msra.mxu0 %v65_v29  ;;  %373 = vmatpush3.msra.mxu1 %v161_v33 }
  0x47   :  { %340 = vmatmul.mubr.f32.vlgmr.msra.gmra.mxu0 %v64_v30 }
 0x107   :  { %v154_v35 = vpop.f32.mrf.mxu0 }
 0x108   :  { %v155_v36 = vadd.f32 %v271_v34, %v154_v35 }
 0x109   :  { %v341_v37 = vpop.f32.mrf.mxu0 }
 0x10a   :  { %v158_v38 = vmax.f32 %v155_v36, 0.0 }
 0x10c   :  { %375 = vmatmul.mubr.f32.vlgmr.msra.gmra.mxu1 %v158_v38 }
 0x1cc   :  { %v250_v40 = vpop.f32.mrf.mxu1 }
 0x1cd   :  { %v251_v41 = vadd.f32 %v272_v39, %v250_v40 }
 0x1ce   :  { %v376_v42 = vpop.f32.mrf.mxu1 }
 0x1cf   :  { %254 = vst [vmem:[#allocation9] sm:$0xff] %v251_v41 }
 0x1d0   :  { %456 = shalt.err (!%p453_p5)
}
 0x1d1   :  { %264 = dma.vmem_to_hbm [thread:$0]  %s262_s12, 128, %s566_s5, [#allocation5]  }
 0x1d2   :  { %469 = dma.done.wait [#allocation5], 128  }
 0x1d3   :  { %470 = vsyncadd [#allocation5], 4294967168 }
 0x1d4   :  { %268 = vsyncpa [#allocation4], 1 }
 0x1d5   :  { %269 = vsyncpa [#allocation7], 1 }
 0x1d6   :  { %270 = vsyncpa [#allocation5], 1 }

</bundles_post_ra>
